<compile_context>
chip_gen: v7x
topology: tpu7x:2x2x1
jax: 0.10.0
libtpu: 0.0.40
codegen_flags: <defaults>
</compile_context>

<pallas_src>
import jax
import jax.numpy as jnp
from jax.experimental import pallas as pl
from jax.experimental.pallas import tpu as pltpu


def _copy_kernel(x_ref, o_ref):
    # Identity copy of the current lane/sublane-dense tile.
    o_ref[...] = x_ref[...]


def _pallas_flatten_copy(flat, *, target_tile_bytes=2 << 20):
    """Identity copy of a 1-D array through a tiled, lane-dense Pallas kernel."""
    t = flat.shape[0]
    itemsize = jnp.dtype(flat.dtype).itemsize
    # dtype-aware sublane packing: f32 -> 8, bf16 -> 16, int8/fp8 -> 32.
    sub = {4: 8, 2: 16, 1: 32}.get(itemsize, 8)
    lane = 128

    # Lane-dense column count: largest 128-multiple that doesn't over-pad
    # tiny inputs (fall back to 128).
    ccols = lane
    for cand in (2048, 1024, 512, 256, 128):
        if t >= cand * sub:
            ccols = cand
            break

    # Rows of the 2-D view, rounded up to the sublane packing.
    rows = pl.cdiv(t, ccols)
    rows = pl.cdiv(rows, sub) * sub

    # Block rows: aim for ~target_tile_bytes per tile, multiple of `sub`.
    max_rows_per_tile = max(sub, (target_tile_bytes // (ccols * itemsize)) // sub * sub)
    block_rows = min(rows, max_rows_per_tile)

    # Pad the row count so the grid divides evenly -> every tile is fully
    # dense and every store is an unmasked vst.
    num_blocks = pl.cdiv(rows, block_rows)
    rows = num_blocks * block_rows
    padded_t = rows * ccols

    if padded_t != t:
        flat = jnp.pad(flat, (0, padded_t - t))
    x2d = flat.reshape(rows, ccols)

    out2d = pl.pallas_call(
        _copy_kernel,
        out_shape=jax.ShapeDtypeStruct((rows, ccols), x2d.dtype),
        grid_spec=pltpu.PrefetchScalarGridSpec(
            num_scalar_prefetch=0,
            grid=(num_blocks,),
            in_specs=[pl.BlockSpec((block_rows, ccols), lambda i: (i, 0))],
            out_specs=pl.BlockSpec((block_rows, ccols), lambda i: (i, 0)),
        ),
        compiler_params=pltpu.CompilerParams(
            # Independent tiles -> shardable across v7x's 2 TensorCores.
            dimension_semantics=("parallel",),
            # ~8 MiB peak (2 MiB tile x in/out x double buffer); 32 MiB limit
            # is safe on v5e/v6e (128 MiB physical) and v7x (64 MiB physical).
            vmem_limit_bytes=32 << 20,
        ),
    )(x2d)

    out_flat = out2d.reshape(-1)
    if padded_t != t:
        out_flat = out_flat[:t]
    return out_flat


def flatten(x, keep_batch_dim=True, *, materialize=False, target_tile_bytes=2 << 20):
    """JAX/Pallas equivalent of Flatten.forward.

    materialize=False (default, recommended): metadata-only reshape, no kernel.
    materialize=True: force a distinct output buffer via the Pallas copy kernel.
    """
    n = x.shape[0]
    flat = jnp.reshape(x, (-1,))          # row-major, == torch .view (free)
    if materialize:
        flat = _pallas_flatten_copy(flat, target_tile_bytes=target_tile_bytes)
    if keep_batch_dim:
        return flat.reshape(n, -1)
    return flat


if __name__ == "__main__":
    key = jax.random.PRNGKey(0)
    # Small NCHW input consistent with a conv feature map: (2, 4, 16, 16).
    x = jax.random.normal(key, (2, 4, 16, 16), dtype=jnp.float32)

    # Pallas (materializing) path, keep_batch_dim=True.
    y = jax.block_until_ready(flatten(x, keep_batch_dim=True, materialize=True))
    ref = jnp.reshape(x, (x.shape[0], -1))
    assert y.shape == (2, 4 * 16 * 16)
    assert jnp.array_equal(y, ref)

    # Pallas path, keep_batch_dim=False.
    y_flat = jax.block_until_ready(flatten(x, keep_batch_dim=False, materialize=True))
    ref_flat = jnp.reshape(x, (-1,))
    assert y_flat.shape == (2 * 4 * 16 * 16,)
    assert jnp.array_equal(y_flat, ref_flat)

    # Non-128-divisible feature size (C*H*W = 300) exercises the padded path.
    x2 = jax.random.normal(jax.random.PRNGKey(1), (2, 3, 10, 10), dtype=jnp.float32)
    y2 = jax.block_until_ready(flatten(x2, keep_batch_dim=True, materialize=True))
    assert y2.shape == (2, 300)
    assert jnp.array_equal(y2, jnp.reshape(x2, (2, -1)))

    # bf16 exercises the dtype-aware (16-row) sublane packing.
    x3 = x.astype(jnp.bfloat16)
    y3 = jax.block_until_ready(flatten(x3, keep_batch_dim=True, materialize=True))
    assert jnp.array_equal(y3, jnp.reshape(x3, (2, -1)))

    # Default production path: metadata-only reshape (no kernel, zero HBM traffic).
    y0 = jax.block_until_ready(flatten(x, keep_batch_dim=True))
    assert jnp.array_equal(y0, ref)

    print("KERNEL_OK")
</pallas_src>

<mosaic_0001>
module attributes {stable_mosaic.version = 11 : i64} {
  func.func @_copy_kernel(%arg0: i32, %arg1: memref<8x256xf32, #tpu.memory_space<vmem>>, %arg2: memref<8x256xf32, #tpu.memory_space<vmem>>) attributes {dimension_semantics = [#tpu.dimension_semantics<parallel>], iteration_bounds = array<i64: 1>, scalar_prefetch = 0 : i64, scratch_operands = 0 : i64, tpu.core_type = #tpu.core_type<tc>, window_params = [{transform_indices = @transform_0, window_bounds = array<i64: 8, 256>}, {transform_indices = @transform_1, window_bounds = array<i64: 8, 256>}]} {
    %c0 = arith.constant 0 : index
    %c0_0 = arith.constant 0 : index
    %0 = vector.load %arg1[%c0, %c0_0] : memref<8x256xf32, #tpu.memory_space<vmem>>, vector<8x256xf32>
    %c0_1 = arith.constant 0 : index
    %c0_2 = arith.constant 0 : index
    %1 = vector.load %arg2[%c0_1, %c0_2] : memref<8x256xf32, #tpu.memory_space<vmem>>, vector<8x256xf32>
    tpu.vector_store %arg2[%c0_1, %c0_2], %0 {strides = array<i32>} : memref<8x256xf32, #tpu.memory_space<vmem>>, vector<8x256xf32>,
    return
  }
  func.func @transform_0(%arg0: i32) -> (i32, i32) {
    %c0_i32 = arith.constant 0 : i32
    %c0_i32_0 = arith.constant 0 : i32
    return %arg0, %c0_i32 : i32, i32
  }
  func.func @transform_1(%arg0: i32) -> (i32, i32) {
    %c0_i32 = arith.constant 0 : i32
    %c0_i32_0 = arith.constant 0 : i32
    return %arg0, %c0_i32 : i32, i32
  }
}

</mosaic_0001>

<bundles_post_ra>
// kernel: tpu_custom_call.1
= control target key start
LH: loop header
LB: loop body
LE: loop exit
PB: predicated region body
PF: predicated region fallthrough
CT: control target
= control target key end

     0   :  { %6 = vsyncpa [#allocation3], 0  ;;  %s126_s0 = inlined_call_operand.hbm [shape: f32[8,256], index: 0, kind: input, shape index: {}]   ;;  %s127_s1 = inlined_call_operand.hbm [shape: f32[8,256], index: 1, kind: output, shape index: {}]  }
   0x1   :  { %7 = vsyncpa [#allocation4], 0  ;;  %s90_s6 = smov [#allocation2]   ;;  %s42_s10 = scalar_lea.hbm %s126_s0, 256 }
   0x2   :  { %s14_s7 = sshll.u32 %s90_s6, 4  ;;  %p43_p0 = scmp.ne.s32.totalorder %s126_s0, %s42_s10  ;;  %s15_s7 = int_to_ptr.vmem [resolvable:$true] %s14_s7 }
   0x3   :  { %p46_p1 = scmp.lt.u32.totalorder %s42_s10, %s126_s0 }
   0x5   :  { %p48_p2 = pnand %p46_p1, %p43_p0 }
   0x7   :  { %51 = shalt.err (!%p48_p2)
}
   0x8   :  { %s52_s15 = scalar_lea.vmem %s15_s7, 256  ;;  %p57_p4 = scmp.lt.s32.totalorder %s15_s7, %s15_s7 }
   0x9   :  { %p53_p3 = scmp.ne.s32.totalorder %s15_s7, %s52_s15  ;;  %p58_p5 = scmp.lt.s32.totalorder %s52_s15, %s52_s15 }
   0xb   :  { %p59_p6 = por %p58_p5, %p57_p4 }
   0xd   :  { %p60_p7 = pnand %p59_p6, %p53_p3 }
   0xf   :  { %63 = shalt.err (!%p60_p7)
}
  0x10   :  { %17 = dma.hbm_to_vmem [thread:$0]  %s126_s0, 256, %s15_s7, [#allocation3]  }
  0x11   :  { %86 = dma.done.wait [#allocation3], 256  }
  0x12   :  { %87 = vsyncadd [#allocation3], 4294967040  ;;  %s91_s18 = smov [#allocation5]   ;;  %v21_v0 = vld [vmem:[#allocation2] sm:$0xff]  ;;  %v22_v1 = vld [vmem:[#allocation2 + $0x8] sm:$0xff] }
  0x13   :  { %s31_s19 = sshll.u32 %s91_s18, 4  ;;  %23 = vst [vmem:[#allocation5] sm:$0xff] %v21_v0  ;;  %24 = vst [vmem:[#allocation5 + $0x8] sm:$0xff] %v22_v1  ;;  %s32_s19 = int_to_ptr.vmem [resolvable:$true] %s31_s19 }
  0x14   :  { %s64_s20 = scalar_lea.vmem %s32_s19, 256  ;;  %p69_p9 = scmp.lt.s32.totalorder %s32_s19, %s32_s19 }
  0x15   :  { %p65_p8 = scmp.ne.s32.totalorder %s32_s19, %s64_s20  ;;  %p70_p10 = scmp.lt.s32.totalorder %s64_s20, %s64_s20 }
  0x17   :  { %p71_p11 = por %p70_p10, %p69_p9 }
  0x19   :  { %p72_p12 = pnand %p71_p11, %p65_p8 }
  0x1b   :  { %75 = shalt.err (!%p72_p12)
}
  0x1c   :  { %s76_s0 = scalar_lea.hbm %s127_s1, 256 }
  0x1d   :  { %p77_p13 = scmp.ne.s32.totalorder %s127_s1, %s76_s0  ;;  %p80_p0 = scmp.lt.u32.totalorder %s76_s0, %s127_s1 }
  0x1f   :  { %p82_p1 = pnand %p80_p0, %p77_p13 }
  0x21   :  { %85 = shalt.err (!%p82_p1)
}
  0x22   :  { %34 = dma.vmem_to_hbm [thread:$0]  %s32_s19, 256, %s127_s1, [#allocation4]  }
  0x23   :  { %88 = dma.done.wait [#allocation4], 256  }
  0x24   :  { %89 = vsyncadd [#allocation4], 4294967040 }
  0x25   :  { %38 = vsyncpa [#allocation3], 1 }
  0x26   :  { %39 = vsyncpa [#allocation4], 1 }

</bundles_post_ra>
